<compile_context>
chip_gen: v7x
topology: tpu7x:2x2x1
jax: 0.10.0
libtpu: 0.0.40
codegen_flags: <defaults>
</compile_context>

<pallas_src>
import jax
import jax.numpy as jnp
from jax.experimental import pallas as pl
from jax.experimental.pallas import tpu as pltpu


def _round_up(x, m):
    return ((x + m - 1) // m) * m


def mlp_kernel(x_ref, w1_ref, b1_ref, w2_ref, b2_ref, o_ref):
    # x: (TILE_B, dim) streamed block (f32 or bf16); w1: (dim, h), b1: (1, h),
    # w2: (1, h) VMEM-resident; b2: (1, 1) SMEM scalar; o: (1, TILE_B) lane-dense.
    x = x_ref[...]
    w1 = w1_ref[...]
    # Layer 1 on the MXU, accumulating in f32.
    h = jnp.dot(x, w1, preferred_element_type=jnp.float32)
    h = jnp.maximum(h + b1_ref[...], 0.0)                   # bias + ReLU (VPU)
    # Dropout(0.2): identity at inference (no-op).
    # Layer 2 (h -> 1): VPU multiply + lane reduction instead of an N=1 MXU
    # matmul (avoids a 1-lane-wide MXU result / masked stores).
    y = jnp.sum(h * w2_ref[...], axis=-1) + b2_ref[0, 0]    # (TILE_B,)
    o_ref[...] = y[None, :].astype(o_ref.dtype)             # batch on lanes


def mlp_forward(x, w1, b1, w2, b2, *, tile_b=8192, stream_in_bf16=False):
    """Fused MLP forward. x: (B, dim) float32 -> (B,) float32.

    stream_in_bf16: opt-in; casts the streamed x and resident W1 to bf16
    (halves HBM traffic of the bandwidth-bound x stream), f32 accumulation.
    """
    B, dim = x.shape
    h = w1.shape[1]

    # ---- batch tiling -----------------------------------------------------
    # Pick the number of grid steps first, then a 128-aligned tile:
    #  * tiles as large as tile_b to amortize per-step overhead (~1 MiB of
    #    streamed x per step at the default),
    #  * at least 2 steps whenever the batch allows it, so v7x's two
    #    TensorCores both get work on the "parallel" axis (no-op on v5e/v6e),
    #  * padding bounded by 127 rows per step.
    B_pad128 = _round_up(B, 128)
    num_steps = pl.cdiv(B_pad128, tile_b)
    if B_pad128 >= 256:
        num_steps = max(num_steps, 2)
    tb = _round_up(pl.cdiv(B_pad128, num_steps), 128)
    B_pad = tb * num_steps
    if B_pad != B:
        x = jnp.pad(x, ((0, B_pad - B), (0, 0)))
    grid = (num_steps,)

    # ---- operand dtypes / layouts ------------------------------------------
    stream_dtype = jnp.bfloat16 if stream_in_bf16 else x.dtype
    x_stream = x.astype(stream_dtype)
    w1_stream = w1.astype(stream_dtype)
    b1_row = b1.reshape(1, h).astype(jnp.float32)
    w2_row = w2.reshape(1, h).astype(jnp.float32)    # (1, h) row for VPU reduce
    b2_smem = b2.reshape(1, 1).astype(jnp.float32)   # SMEM scalar

    # ---- x BlockSpec: deeper pipelining only when tiles are forced small ----
    x_spec_kwargs = {}
    if tb <= 1024 and num_steps >= 2:
        # Tiny per-step transfers expose DMA issue latency rather than
        # bandwidth; one extra buffer hides it at negligible VMEM cost.
        x_spec_kwargs["pipeline_mode"] = pl.Buffered(3)
    x_spec = pl.BlockSpec((tb, dim), lambda i: (i, 0), **x_spec_kwargs)

    # ---- compiler params (scoped-VMEM bump only for very large tiles) -------
    item = jnp.dtype(stream_dtype).itemsize
    vmem_est = (
        3 * tb * dim * item            # x blocks (up to triple-buffered)
        + 3 * tb * h * 4               # hidden-layer f32 temporaries
        + 2 * tb * 4                   # output blocks
        + 2 * dim * h * item + 4 * h * 4  # resident weights / biases
    )
    cp_kwargs = dict(dimension_semantics=("parallel",))
    if vmem_est > 12 * 1024 * 1024:
        # Only kicks in if tile_b is pushed well past ~8K f32 rows (v5e's
        # scoped default is 16 MiB); stay under v7x's 64 MiB physical VMEM.
        cp_kwargs["vmem_limit_bytes"] = int(min(2 * vmem_est, 60 * 1024 * 1024))

    cost = pl.CostEstimate(
        flops=2 * B_pad * dim * h + 2 * B_pad * h,
        bytes_accessed=(
            B_pad * dim * item          # streamed x (padded footprint)
            + dim * h * item            # resident W1 (DMA'd once)
            + 2 * h * 4 + 4             # b1, w2 row, b2
            + B_pad * 4                 # (1, B_pad) f32 output
        ),
        transcendentals=0,
    )

    out = pl.pallas_call(
        mlp_kernel,
        out_shape=jax.ShapeDtypeStruct((1, B_pad), jnp.float32),
        grid=grid,
        in_specs=[
            x_spec,                                             # x: streamed tiles
            pl.BlockSpec((dim, h), lambda i: (0, 0)),           # W1: VMEM resident
            pl.BlockSpec((1, h), lambda i: (0, 0)),             # b1: resident
            pl.BlockSpec((1, h), lambda i: (0, 0)),             # w2 row: resident
            pl.BlockSpec(memory_space=pltpu.MemorySpace.SMEM),  # b2 scalar
        ],
        out_specs=pl.BlockSpec((1, tb), lambda i: (0, i)),      # lane-dense output
        compiler_params=pltpu.CompilerParams(**cp_kwargs),
        cost_estimate=cost,
    )(x_stream, w1_stream, b1_row, w2_row, b2_smem)

    return out[0, :B]   # drop batch padding; equivalent of .squeeze(1)


if __name__ == "__main__":
    # Small shapes consistent with the module: batch=8, dim=32, hidden=64.
    B, DIM, H = 8, 32, 64

    key = jax.random.PRNGKey(0)
    kx, kw1, kb1, kw2, kb2, kx2, kx3 = jax.random.split(key, 7)

    x = jax.random.normal(kx, (B, DIM), dtype=jnp.float32)

    # Deterministic parameter init (PyTorch-like uniform bounds 1/sqrt(fan_in)),
    # stored in (in, out) layout for the kernel.
    bound1 = 1.0 / (DIM ** 0.5)
    w1 = jax.random.uniform(kw1, (DIM, H), jnp.float32, -bound1, bound1)
    b1 = jax.random.uniform(kb1, (H,), jnp.float32, -bound1, bound1)
    bound2 = 1.0 / (H ** 0.5)
    w2 = jax.random.uniform(kw2, (H, 1), jnp.float32, -bound2, bound2)
    b2 = jax.random.uniform(kb2, (1,), jnp.float32, -bound2, bound2)

    def ref_fn(xv):
        return (jnp.maximum(xv @ w1 + b1, 0.0) @ w2 + b2)[:, 0]

    # 1) Spec-sized run (B=8): single padded 128-row tile.
    out = mlp_forward(x, w1, b1, w2, b2)
    jax.block_until_ready(out)
    assert out.shape == (B,)
    assert jnp.allclose(out, ref_fn(x), atol=1e-4, rtol=1e-4)

    # 2) Multi-tile run (B=1000, not a multiple of the tile): exercises batch
    #    padding, the >=2-step "parallel" grid (v7x 2-TC sharding), and the
    #    Buffered(3) small-tile pipeline path.
    B2 = 1000
    x2 = jax.random.normal(kx2, (B2, DIM), dtype=jnp.float32)
    out2 = mlp_forward(x2, w1, b1, w2, b2)
    jax.block_until_ready(out2)
    assert out2.shape == (B2,)
    assert jnp.allclose(out2, ref_fn(x2), atol=1e-4, rtol=1e-4)

    # 3) Large-batch run (B=20000): exercises the big-tile streamed pipeline
    #    (~6.8K-row tiles, 3 steps) in f32, then the opt-in bf16 streaming path
    #    (looser tolerance since x/W1 are rounded to bf16).
    B3 = 20000
    x3 = jax.random.normal(kx3, (B3, DIM), dtype=jnp.float32)
    out3 = mlp_forward(x3, w1, b1, w2, b2)
    jax.block_until_ready(out3)
    assert out3.shape == (B3,)
    assert jnp.allclose(out3, ref_fn(x3), atol=1e-4, rtol=1e-4)

    out3_bf16 = mlp_forward(x3, w1, b1, w2, b2, stream_in_bf16=True)
    jax.block_until_ready(out3_bf16)
    assert out3_bf16.shape == (B3,)
    assert jnp.allclose(out3_bf16, ref_fn(x3), atol=5e-2, rtol=5e-2)

    print("KERNEL_OK")
</pallas_src>

<mosaic_0001>
module attributes {stable_mosaic.version = 11 : i64} {
  func.func @mlp_kernel(%arg0: i32, %arg1: memref<128x32xf32, #tpu.memory_space<vmem>>, %arg2: memref<32x64xf32, #tpu.memory_space<vmem>>, %arg3: memref<1x64xf32, #tpu.memory_space<vmem>>, %arg4: memref<1x64xf32, #tpu.memory_space<vmem>>, %arg5: memref<1x1xf32, #tpu.memory_space<smem>>, %arg6: memref<1x128xf32, #tpu.memory_space<vmem>>) attributes {dimension_semantics = [#tpu.dimension_semantics<parallel>], iteration_bounds = array<i64: 1>, scalar_prefetch = 0 : i64, scratch_operands = 0 : i64, tpu.core_type = #tpu.core_type<tc>, window_params = [{transform_indices = @transform_0, window_bounds = array<i64: 128, 32>}, {pipeline_mode = #tpu.pipeline_mode<synchronous>, transform_indices = @transform_1, window_bounds = array<i64: 32, 64>}, {pipeline_mode = #tpu.pipeline_mode<synchronous>, transform_indices = @transform_2, window_bounds = array<i64: 1, 64>}, {pipeline_mode = #tpu.pipeline_mode<synchronous>, transform_indices = @transform_3, window_bounds = array<i64: 1, 64>}, {transform_indices = @transform_4, window_bounds = array<i64: 1, 1>}, {transform_indices = @transform_5, window_bounds = array<i64: 1, 128>}]} {
    %c0 = arith.constant 0 : index
    %c0_0 = arith.constant 0 : index
    %0 = vector.load %arg1[%c0, %c0_0] : memref<128x32xf32, #tpu.memory_space<vmem>>, vector<128x32xf32>
    %c0_1 = arith.constant 0 : index
    %c0_2 = arith.constant 0 : index
    %1 = vector.load %arg2[%c0_1, %c0_2] : memref<32x64xf32, #tpu.memory_space<vmem>>, vector<32x64xf32>
    %cst = arith.constant dense<0.000000e+00> : vector<128x64xf32>
    %2 = tpu.matmul %0, %1, %cst {dimension_numbers = #tpu.dot_dimension_numbers<[1], [0], [0], [1], [0, 0, 1, 1], [], []>} : vector<128x32xf32>, vector<32x64xf32>, vector<128x64xf32> -> vector<128x64xf32>
    %c0_3 = arith.constant 0 : index
    %c0_4 = arith.constant 0 : index
    %3 = vector.load %arg3[%c0_3, %c0_4] : memref<1x64xf32, #tpu.memory_space<vmem>>, vector<1x64xf32>
    %4 = vector.broadcast %3 : vector<1x64xf32> to vector<128x64xf32>
    %5 = arith.addf %2, %4 : vector<128x64xf32>
    %cst_5 = arith.constant 0.000000e+00 : f32
    %6 = vector.broadcast %cst_5 : f32 to vector<128x64xf32>
    %7 = arith.maximumf %5, %6 : vector<128x64xf32>
    %c0_6 = arith.constant 0 : index
    %c0_7 = arith.constant 0 : index
    %8 = vector.load %arg4[%c0_6, %c0_7] : memref<1x64xf32, #tpu.memory_space<vmem>>, vector<1x64xf32>
    %9 = vector.broadcast %8 : vector<1x64xf32> to vector<128x64xf32>
    %10 = arith.mulf %7, %9 : vector<128x64xf32>
    %cst_8 = arith.constant dense<0.000000e+00> : vector<128xf32>
    %11 = vector.multi_reduction <add>, %10, %cst_8 [1] : vector<128x64xf32> to vector<128xf32>
    %c0_9 = arith.constant 0 : index
    %c0_10 = arith.constant 0 : index
    %12 = memref.load %arg5[%c0_9, %c0_10] : memref<1x1xf32, #tpu.memory_space<smem>>
    %13 = vector.broadcast %12 : f32 to vector<128xf32>
    %14 = arith.addf %11, %13 : vector<128xf32>
    %15 = vector.shape_cast %14 : vector<128xf32> to vector<1x128xf32>
    %c0_11 = arith.constant 0 : index
    %c0_12 = arith.constant 0 : index
    %16 = vector.load %arg6[%c0_11, %c0_12] : memref<1x128xf32, #tpu.memory_space<vmem>>, vector<1x128xf32>
    tpu.vector_store %arg6[%c0_11, %c0_12], %15 {strides = array<i32>} : memref<1x128xf32, #tpu.memory_space<vmem>>, vector<1x128xf32>,
    return
  }
  func.func @transform_0(%arg0: i32) -> (i32, i32) {
    %c0_i32 = arith.constant 0 : i32
    %c0_i32_0 = arith.constant 0 : i32
    return %arg0, %c0_i32 : i32, i32
  }
  func.func @transform_1(%arg0: i32) -> (i32, i32) {
    %c0_i32 = arith.constant 0 : i32
    %c0_i32_0 = arith.constant 0 : i32
    %c0_i32_1 = arith.constant 0 : i32
    return %c0_i32, %c0_i32_0 : i32, i32
  }
  func.func @transform_2(%arg0: i32) -> (i32, i32) {
    %c0_i32 = arith.constant 0 : i32
    %c0_i32_0 = arith.constant 0 : i32
    %c0_i32_1 = arith.constant 0 : i32
    return %c0_i32, %c0_i32_0 : i32, i32
  }
  func.func @transform_3(%arg0: i32) -> (i32, i32) {
    %c0_i32 = arith.constant 0 : i32
    %c0_i32_0 = arith.constant 0 : i32
    %c0_i32_1 = arith.constant 0 : i32
    return %c0_i32, %c0_i32_0 : i32, i32
  }
  func.func @transform_4(%arg0: i32) -> (i32, i32) {
    %c0_i32 = arith.constant 0 : i32
    %c0_i32_0 = arith.constant 0 : i32
    %c0_i32_1 = arith.constant 0 : i32
    return %c0_i32, %c0_i32_0 : i32, i32
  }
  func.func @transform_5(%arg0: i32) -> (i32, i32) {
    %c0_i32 = arith.constant 0 : i32
    %c0_i32_0 = arith.constant 0 : i32
    return %c0_i32, %arg0 : i32, i32
  }
}

</mosaic_0001>

<bundles_post_ra>
// kernel: tpu_custom_call.1
= control target key start
LH: loop header
LB: loop body
LE: loop exit
PB: predicated region body
PF: predicated region fallthrough
CT: control target
= control target key end

     0   :  { %vm49_vm0 = vcmask 261120   ;;  %s858_s0 = inlined_call_operand.vmem [shape: f32[128,32], index: 0, kind: input, shape index: {}]   ;;  %s859_s1 = inlined_call_operand.vmem [shape: f32[32,64], index: 1, kind: input, shape index: {}]   ;;  %s860_s2 = inlined_call_operand.vmem [shape: f32[1,64], index: 2, kind: input, shape index: {}]   ;;  %s861_s3 = inlined_call_operand.vmem [shape: f32[1,64], index: 3, kind: input, shape index: {}]   ;;  %s862_s4 = inlined_call_operand.<no memory space> [shape: f32[1,1], index: 4, kind: input, shape index: {}]   ;;  %s863_s5 = inlined_call_operand.hbm [shape: f32[1,128], index: 5, kind: output, shape index: {}]  }
   0x1   :  { %v38_v0 = vld [vmem:[%s859_s1] sm:$0xff]  ;;  %v39_v1 = vld [vmem:[%s859_s1 + $0x8] sm:$0xff]  ;;  %v40_v2 = vld [vmem:[%s859_s1 + $0x10] sm:$0xff] }
   0x2   :  { %v562_v3 = vpack.c.bf16 %v39_v1, %v38_v0  ;;  %v41_v4 = vld [vmem:[%s859_s1 + $0x18] sm:$0xff]  ;;  %v22_v5 = vld [vmem:[%s858_s0] sm:$0xff] }
   0x3   :  { %v30_v6 = vld [vmem:[%s858_s0 + $0x40] sm:$0xff]  ;;  %v566_v7 = vpack.c.bf16 %v41_v4, %v40_v2  ;;  %538 = vmatprep.mubr.msk.f32.mxu0 %vm49_vm0, %v22_v5 }
   0x4   :  { %550 = vmatprep.mubr.msk.f32.mxu1 %vm49_vm0, %v30_v6  ;;  %563 = vmatprep.subr.bf16.mxu0 %v562_v3 }
   0x5   :  { %570 = vmatprep.subr.bf16.mxu1 %v562_v3  ;;  %565 = vmatpush3.bf16.msra.mxu0 %v562_v3 }
   0x6   :  { %572 = vmatpush3.bf16.msra.mxu1 %v562_v3  ;;  %567 = vmatprep.subr.bf16.mxu0 %v566_v7 }
   0x7   :  { %571 = vmatprep.subr.bf16.mxu1 %v566_v7 }
   0x8   :  { %11 = vsyncpa [#allocation4], 0  ;;  %v23_v8 = vld [vmem:[%s858_s0 + $0x8] sm:$0xff]  ;;  %v24_v10 = vld [vmem:[%s858_s0 + $0x10] sm:$0xff]  ;;  %vm282_vm1 = vcmask 523264   ;;  %vm376_vm2 = vcmask 130112  }
   0x9   :  { %569 = vmatpush3.bf16.msra.mxu0 %v566_v7  ;;  %v31_v9 = vld [vmem:[%s858_s0 + $0x48] sm:$0xff]  ;;  %v32_v11 = vld [vmem:[%s858_s0 + $0x50] sm:$0xff]  ;;  %v25_v12 = vld [vmem:[%s858_s0 + $0x18] sm:$0xff]  ;;  %vm383_vm3 = vcmask 195712   ;;  %vm390_vm4 = vcmask 261312   ;;  %vm397_vm5 = vcmask 326912  }
   0xa   :  { %573 = vmatpush3.bf16.msra.mxu1 %v566_v7  ;;  %v33_v13 = vld [vmem:[%s858_s0 + $0x58] sm:$0xff]  ;;  %v26_v14 = vld [vmem:[%s858_s0 + $0x20] sm:$0xff]  ;;  %v27_v16 = vld [vmem:[%s858_s0 + $0x28] sm:$0xff]  ;;  %vm404_vm6 = vcmask 392512   ;;  %vm411_vm7 = vcmask 458112   ;;  %vm418_vm8 = vcmask 523712  }
   0xb   :  { %v34_v15 = vld [vmem:[%s858_s0 + $0x60] sm:$0xff]  ;;  %v35_v17 = vld [vmem:[%s858_s0 + $0x68] sm:$0xff]  ;;  %v28_v18 = vld [vmem:[%s858_s0 + $0x30] sm:$0xff]  ;;  %vm425_vm9 = vcmask 589312   ;;  %vm432_vm10 = vcmask 654912   ;;  %vm439_vm11 = vcmask 720512  }
   0xc   :  { %539 = vmatmul.mubr.msk.f32.vlgmr.msra.gmra.mrb[0].mxu0 %vm49_vm0, %v23_v8  ;;  %v36_v19 = vld [vmem:[%s858_s0 + $0x70] sm:$0xff]  ;;  %v29_v20 = vld [vmem:[%s858_s0 + $0x38] sm:$0xff]  ;;  %v709_v22 = vld [vmem:[%s860_s2] ss:$0 sm:$0xff]  ;;  %vm446_vm12 = vcmask 786112   ;;  %vm453_vm13 = vcmask 851712  }
   0xd   :  { %551 = vmatmul.mubr.msk.f32.vlgmr.msra.gmra.mrb[0].mxu1 %vm49_vm0, %v31_v9  ;;  %541 = vmatprep.mubr.msk.f32.mxu0 %vm49_vm0, %v24_v10  ;;  %v37_v21 = vld [vmem:[%s858_s0 + $0x78] sm:$0xff]  ;;  %v718_v31 = vld [vmem:[%s861_s3] ss:$0 sm:$0xff]  ;;  %vm460_vm14 = vcmask 917312   ;;  %vm467_vm15 = vcmask 982912  }
   0xe   :  { %553 = vmatprep.mubr.msk.f32.mxu1 %vm49_vm0, %v32_v11 }
  0x10   :  { %542 = vmatmul.mubr.msk.f32.gmra.mrb[2].mxu0 %vm49_vm0, %v25_v12 }
  0x11   :  { %554 = vmatmul.mubr.msk.f32.gmra.mrb[2].mxu1 %vm49_vm0, %v33_v13  ;;  %544 = vmatprep.mubr.msk.f32.mxu0 %vm49_vm0, %v26_v14 }
  0x12   :  { %556 = vmatprep.mubr.msk.f32.mxu1 %vm49_vm0, %v34_v15 }
  0x14   :  { %545 = vmatmul.mubr.msk.f32.gmra.mrb[4].mxu0 %vm49_vm0, %v27_v16 }
  0x15   :  { %557 = vmatmul.mubr.msk.f32.gmra.mrb[4].mxu1 %vm49_vm0, %v35_v17  ;;  %547 = vmatprep.mubr.msk.f32.mxu0 %vm49_vm0, %v28_v18 }
  0x16   :  { %559 = vmatprep.mubr.msk.f32.mxu1 %vm49_vm0, %v36_v19 }
  0x18   :  { %548 = vmatmul.mubr.msk.f32.gmra.mrb[6].mxu0 %vm49_vm0, %v29_v20 }
  0x19   :  { %560 = vmatmul.mubr.msk.f32.gmra.mrb[6].mxu1 %vm49_vm0, %v37_v21  ;;  %vm474_vm0 = vcmask 1048512  }
  0xdf   :  { %v540_v23 = vpop.f32.mrb[0].mxu0 }
  0xe0   :  { %v552_v24 = vpop.f32.mrb[0].mxu1  ;;  %v170_v25 = vadd.f32 %v540_v23, %v709_v22  ;;  %v164_v27 = vpop.f32.mrb[1].mxu0 }
  0xe1   :  { %v210_v26 = vadd.f32 %v552_v24, %v709_v22  ;;  %v204_v28 = vpop.f32.mrb[1].mxu1  ;;  %v165_v29 = vadd.f32 %v709_v22, %v164_v27 }
  0xe2   :  { %v205_v30 = vadd.f32 %v709_v22, %v204_v28  ;;  %v244_v32 = vmax.f32 %v170_v25, 0.0 }
  0xe3   :  { %v252_v33 = vmax.f32 %v210_v26, 0.0  ;;  %v243_v34 = vmax.f32 %v165_v29, 0.0  ;;  %v543_v35 = vpop.f32.mrb[2].mxu0 }
  0xe4   :  { %v555_v36 = vpop.f32.mrb[2].mxu1  ;;  %v180_v37 = vadd.f32 %v543_v35, %v709_v22  ;;  %v174_v38 = vpop.f32.mrb[3].mxu0  ;;  %v267_v41 = vmul.f32 %v718_v31, %v244_v32  ;;  %v251_v43 = vmax.f32 %v205_v30, 0.0 }
  0xe5   :  { %v275_v39 = vmul.f32 %v718_v31, %v252_v33  ;;  %v220_v40 = vadd.f32 %v555_v36, %v709_v22  ;;  %v214_v42 = vpop.f32.mrb[3].mxu1  ;;  %v175_v44 = vadd.f32 %v709_v22, %v174_v38  ;;  %v266_v46 = vmul.f32 %v718_v31, %v243_v34 }
  0xe6   :  { %v215_v45 = vadd.f32 %v709_v22, %v214_v42  ;;  %v246_v47 = vmax.f32 %v180_v37, 0.0  ;;  %v286_v50 = vsel %vm282_vm1, %v267_v41, 0.0  ;;  %v274_v59 = vmul.f32 %v718_v31, %v251_v43 }
  0xe7   :  { %v310_v48 = vsel %vm282_vm1, %v275_v39, 0.0  ;;  %v254_v49 = vmax.f32 %v220_v40, 0.0  ;;  %287 = vadd.xlane.f32.xlu0 %v286_v50  ;;  %v546_v51 = vpop.f32.mrb[4].mxu0  ;;  %v245_v60 = vmax.f32 %v175_v44, 0.0  ;;  %v283_v63 = vsel %vm282_vm1, %v266_v46, 0.0 }
  0xe8   :  { %311 = vadd.xlane.f32.xlu1 %v310_v48  ;;  %v558_v52 = vpop.f32.mrb[4].mxu1  ;;  %v269_v53 = vmul.f32 %v718_v31, %v246_v47  ;;  %v190_v54 = vadd.f32 %v546_v51, %v709_v22  ;;  %v184_v55 = vpop.f32.mrb[5].mxu0  ;;  %v253_v61 = vmax.f32 %v215_v45, 0.0  ;;  %v307_v9 = vsel %vm282_vm1, %v274_v59, 0.0 }
  0xe9   :  { %v277_v56 = vmul.f32 %v718_v31, %v254_v49  ;;  %v224_v57 = vpop.f32.mrb[5].mxu1  ;;  %v185_v58 = vadd.f32 %v709_v22, %v184_v55  ;;  %v268_v10 = vmul.f32 %v718_v31, %v245_v60  ;;  %v230_v12 = vadd.f32 %v558_v52, %v709_v22 }
  0xea   :  { %v292_v62 = vsel %vm282_vm1, %v269_v53, 0.0  ;;  %v248_v2 = vmax.f32 %v190_v54, 0.0  ;;  %v276_v11 = vmul.f32 %v718_v31, %v253_v61  ;;  %v225_v13 = vadd.f32 %v709_v22, %v224_v57 }
  0xeb   :  { %284 = vadd.xlane.f32.xlu0 %v283_v63  ;;  %v549_v0 = vpop.f32.mrb[6].mxu0  ;;  %v247_v3 = vmax.f32 %v185_v58, 0.0  ;;  %v316_v4 = vsel %vm282_vm1, %v277_v56, 0.0  ;;  %v289_v18 = vsel %vm282_vm1, %v268_v10, 0.0  ;;  %v256_v20 = vmax.f32 %v230_v12, 0.0 }
  0xec   :  { %293 = vadd.xlane.f32.xlu1 %v292_v62  ;;  %v561_v1 = vpop.f32.mrb[6].mxu1  ;;  %v200_v5 = vadd.f32 %v549_v0, %v709_v22  ;;  %v194_v6 = vpop.f32.mrb[7].mxu0  ;;  %v271_v16 = vmul.f32 %v718_v31, %v248_v2  ;;  %v313_v19 = vsel %vm282_vm1, %v276_v11, 0.0  ;;  %v255_v21 = vmax.f32 %v225_v13, 0.0 }
  0xed   :  { %v234_v7 = vpop.f32.mrb[7].mxu1  ;;  %v195_v8 = vadd.f32 %v709_v22, %v194_v6  ;;  %v270_v17 = vmul.f32 %v718_v31, %v247_v3  ;;  %v240_v23 = vadd.f32 %v561_v1, %v709_v22  ;;  %v279_v29 = vmul.f32 %v718_v31, %v256_v20 }
  0xee   :  { %v250_v14 = vmax.f32 %v200_v5, 0.0  ;;  %v235_v24 = vadd.f32 %v709_v22, %v234_v7  ;;  %v298_v25 = vsel %vm282_vm1, %v271_v16, 0.0  ;;  %v278_v30 = vmul.f32 %v718_v31, %v255_v21 }
  0xef   :  { %308 = vadd.xlane.f32.xlu0 %v307_v9  ;;  %v249_v15 = vmax.f32 %v195_v8, 0.0  ;;  %v295_v26 = vsel %vm282_vm1, %v270_v17, 0.0  ;;  %v258_v32 = vmax.f32 %v240_v23, 0.0  ;;  %v322_v35 = vsel %vm282_vm1, %v279_v29, 0.0 }
  0xf0   :  { %317 = vadd.xlane.f32.xlu1 %v316_v4  ;;  %v273_v27 = vmul.f32 %v718_v31, %v250_v14  ;;  %v257_v33 = vmax.f32 %v235_v24, 0.0  ;;  %v319_v36 = vsel %vm282_vm1, %v278_v30, 0.0  ;;  %v365_v41 = vlaneseq }
  0xf1   :  { %v272_v28 = vmul.f32 %v718_v31, %v249_v15  ;;  %v281_v37 = vmul.f32 %v718_v31, %v258_v32  ;;  %v774_v48 = vstv %s862_s4  ;;  %s599_s4 = smov [#allocation3]  }
  0xf2   :  { %v304_v34 = vsel %vm282_vm1, %v273_v27, 0.0  ;;  %v280_v38 = vmul.f32 %v718_v31, %v257_v33  ;;  %v766_v44 = vand.u32 127, %v365_v41  ;;  %v768_v47 = vshrl.u32 %v365_v41, 7  ;;  %s484_s9 = sshll.u32 %s599_s4, 4  ;;  %s485_s9 = int_to_ptr.vmem [resolvable:$true] %s484_s9 }
  0xf3   :  { %314 = vadd.xlane.f32.xlu0 %v313_v19  ;;  %v301_v22 = vsel %vm282_vm1, %v272_v28, 0.0  ;;  %v328_v39 = vsel %vm282_vm1, %v281_v37, 0.0  ;;  %s575_s10 = scalar_lea.vmem %s485_s9, 16  ;;  %s579_s11 = scalar_lea.vmem %s485_s9, 32 }
  0xf4   :  { %290 = vadd.xlane.f32.xlu1 %v289_v18  ;;  %v325_v40 = vsel %vm282_vm1, %v280_v38, 0.0  ;;  %v371_v31 = vadd.s32 4294967288, %v766_v44  ;;  %v378_v49 = vadd.s32 4294967280, %v766_v44  ;;  %v369_v50 = vsub.s32 %v766_v44, %v768_v47  ;;  %p576_p0 = scmp.ne.s32.totalorder %s485_s9, %s575_s10  ;;  %p580_p1 = scmp.lt.s32.totalorder %s485_s9, %s485_s9 }
  0xf5   :  { %v783_v54 = vadd.s32 4294967224, %v766_v44  ;;  %v385_v55 = vadd.s32 4294967272, %v766_v44  ;;  %v789_v58 = vadd.s32 4294967232, %v766_v44  ;;  %v392_v60 = vadd.s32 4294967264, %v766_v44  ;;  %p581_p2 = scmp.lt.s32.totalorder %s579_s11, %s575_s10 }
  0xf6   :  { %v374_v56 = vsub.s32 %v371_v31, %v768_v47  ;;  %v381_v59 = vsub.s32 %v378_v49, %v768_v47  ;;  %v794_v62 = vadd.s32 4294967208, %v766_v44  ;;  %v797_v0 = vadd.s32 4294967216, %v766_v44 }
  0xf7   :  { %296 = vadd.xlane.f32.xlu0 %v295_v26  ;;  %v399_v2 = vadd.s32 4294967256, %v766_v44  ;;  %v430_v3 = vsub.s32 %v783_v54, %v768_v47  ;;  %v388_v4 = vsub.s32 %v385_v55, %v768_v47  ;;  %v413_v8 = vadd.s32 4294967240, %v766_v44  ;;  %p582_p3 = por %p581_p2, %p580_p1 }
  0xf8   :  { %299 = vadd.xlane.f32.xlu1 %v298_v25  ;;  %v423_v9 = vsub.s32 %v789_v58, %v768_v47  ;;  %v395_v11 = vsub.s32 %v392_v60, %v768_v47  ;;  %v406_v12 = vadd.s32 4294967248, %v766_v44  ;;  %v444_v14 = vsub.s32 %v794_v62, %v768_v47 }
  0xf9   :  { %v437_v15 = vsub.s32 %v797_v0, %v768_v47  ;;  %v402_v16 = vsub.s32 %v399_v2, %v768_v47  ;;  %v416_v24 = vsub.s32 %v413_v8, %v768_v47  ;;  %v455_v25 = vadd.s32 4294967192, %v766_v44  ;;  %p583_p4 = pnand %p582_p3, %p576_p0 }
  0xfa   :  { %v409_v27 = vsub.s32 %v406_v12, %v768_v47  ;;  %v448_v33 = vadd.s32 4294967200, %v766_v44 }
  0xfb   :  { %302 = vadd.xlane.f32.xlu0 %v301_v22  ;;  %v458_v38 = vsub.s32 %v455_v25, %v768_v47 }
  0xfc   :  { %305 = vadd.xlane.f32.xlu1 %v304_v34 }
  0xff   :  { %320 = vadd.xlane.f32.xlu0 %v319_v36 }
 0x100   :  { %323 = vadd.xlane.f32.xlu1 %v322_v35 }
 0x103   :  { %326 = vadd.xlane.f32.xlu0 %v325_v40 }
 0x104   :  { %329 = vadd.xlane.f32.xlu1 %v328_v39  ;;  %v469_v39 = vadd.s32 4294967176, %v766_v44 }
 0x106   :  { %v472_v58 = vsub.s32 %v469_v39, %v768_v47 }
 0x174   :  { %v288_v43 = vpop.xlane.xlu0 %287 }
 0x175   :  { %v764_v42 = vpop.xlane.xlu1 %311  ;;  %v334_v57 = vadd.f32 %v774_v48, %v288_v43 }
 0x176   :  { %v342_v37 = vadd.f32 %v774_v48, %v764_v42  ;;  %v451_v42 = vsub.s32 %v448_v33, %v768_v47 }
 0x177   :  { %v375_v6 = vrot.slane %v334_v57, %v374_v56 }
 0x178   :  { %v285_v46 = vpop.xlane.xlu0 %284  ;;  %v431_v55 = vrot.slane %v342_v37, %v430_v3 }
 0x179   :  { %v294_v45 = vpop.xlane.xlu1 %293  ;;  %v333_v51 = vadd.f32 %v774_v48, %v285_v46 }
 0x17a   :  { %v336_v7 = vadd.f32 %v774_v48, %v294_v45  ;;  %v462_v45 = vadd.s32 4294967184, %v766_v44 }
 0x17b   :  { %v370_v61 = vrot.slane %v333_v51, %v369_v50 }
 0x17c   :  { %v309_v53 = vpop.xlane.xlu0 %308  ;;  %v389_v23 = vrot.slane %v336_v7, %v388_v4 }
 0x17d   :  { %v780_v52 = vpop.xlane.xlu1 %317  ;;  %v377_v13 = vsel %vm376_vm2, %v375_v6, %v370_v61  ;;  %v341_v34 = vadd.f32 %v774_v48, %v309_v53 }
 0x17e   :  { %v344_v46 = vadd.f32 %v774_v48, %v780_v52 }
 0x17f   :  { %v424_v51 = vrot.slane %v341_v34, %v423_v9 }
 0x180   :  { %v315_v1 = vpop.xlane.xlu0 %314  ;;  %v445_v60 = vrot.slane %v344_v46, %v444_v14 }
 0x181   :  { %v291_v63 = vpop.xlane.xlu1 %290  ;;  %v343_v40 = vadd.f32 %v774_v48, %v315_v1 }
 0x182   :  { %v335_v5 = vadd.f32 %v774_v48, %v291_v63 }
 0x183   :  { %v438_v52 = vrot.slane %v343_v40, %v437_v15 }
 0x184   :  { %v382_v10 = vrot.slane %v335_v5, %v381_v59  ;;  %v297_v18 = vpop.xlane.xlu0 %296  ;;  %v465_v59 = vsub.s32 %v462_v45, %v768_v47 }
 0x185   :  { %v300_v17 = vpop.xlane.xlu1 %299  ;;  %v337_v21 = vadd.f32 %v774_v48, %v297_v18 }
 0x186   :  { %v384_v19 = vsel %vm383_vm3, %v382_v10, %v377_v13  ;;  %v338_v20 = vadd.f32 %v774_v48, %v300_v17 }
 0x187   :  { %v396_v26 = vrot.slane %v337_v21, %v395_v11  ;;  %v391_v29 = vsel %vm390_vm4, %v389_v23, %v384_v19 }
 0x188   :  { %v403_v28 = vrot.slane %v338_v20, %v402_v16  ;;  %v303_v32 = vpop.xlane.xlu0 %302 }
 0x189   :  { %v306_v30 = vpop.xlane.xlu1 %305  ;;  %v398_v22 = vsel %vm397_vm5, %v396_v26, %v391_v29  ;;  %v339_v36 = vadd.f32 %v774_v48, %v303_v32 }
 0x18a   :  { %v340_v35 = vadd.f32 %v774_v48, %v306_v30  ;;  %v405_v31 = vsel %vm404_vm6, %v403_v28, %v398_v22 }
 0x18b   :  { %v410_v43 = vrot.slane %v339_v36, %v409_v27 }
 0x18c   :  { %v417_v41 = vrot.slane %v340_v35, %v416_v24  ;;  %v321_v50 = vpop.xlane.xlu0 %320 }
 0x18d   :  { %v324_v49 = vpop.xlane.xlu1 %323  ;;  %v412_v53 = vsel %vm411_vm7, %v410_v43, %v405_v31  ;;  %v345_v54 = vadd.f32 %v774_v48, %v321_v50 }
 0x18e   :  { %v419_v56 = vsel %vm418_vm8, %v417_v41, %v412_v53  ;;  %v346_v44 = vadd.f32 %v774_v48, %v324_v49 }
 0x18f   :  { %v426_v57 = vsel %vm425_vm9, %v424_v51, %v419_v56  ;;  %v452_v1 = vrot.slane %v345_v54, %v451_v42 }
 0x190   :  { %v433_v61 = vsel %vm432_vm10, %v431_v55, %v426_v57  ;;  %v327_v63 = vpop.xlane.xlu0 %326  ;;  %v459_v4 = vrot.slane %v346_v44, %v458_v38 }
 0x191   :  { %v330_v62 = vpop.xlane.xlu1 %329  ;;  %v440_v0 = vsel %vm439_vm11, %v438_v52, %v433_v61  ;;  %v347_v3 = vadd.f32 %v774_v48, %v327_v63 }
 0x192   :  { %v348_v2 = vadd.f32 %v774_v48, %v330_v62  ;;  %v447_v5 = vsel %vm446_vm12, %v445_v60, %v440_v0 }
 0x193   :  { %v454_v47 = vsel %vm453_vm13, %v452_v1, %v447_v5  ;;  %v466_v7 = vrot.slane %v347_v3, %v465_v59 }
 0x194   :  { %v473_v6 = vrot.slane %v348_v2, %v472_v58  ;;  %v461_v8 = vsel %vm460_vm14, %v459_v4, %v454_v47 }
 0x195   :  { %v468_v9 = vsel %vm467_vm15, %v466_v7, %v461_v8 }
 0x196   :  { %v475_v10 = vsel %vm474_vm0, %v473_v6, %v468_v9 }
 0x197   :  { %477 = vst [vmem:[#allocation3] sm:$0x1] %v475_v10 }
 0x198   :  { %586 = shalt.err (!%p583_p4)
}
 0x199   :  { %s587_s14 = scalar_lea.hbm %s863_s5, 16 }
 0x19a   :  { %p588_p5 = scmp.ne.s32.totalorder %s863_s5, %s587_s14  ;;  %p591_p6 = scmp.lt.u32.totalorder %s587_s14, %s863_s5 }
 0x19c   :  { %p593_p7 = pnand %p591_p6, %p588_p5 }
 0x19e   :  { %596 = shalt.err (!%p593_p7)
}
 0x19f   :  { %487 = dma.vmem_to_hbm [thread:$0]  %s485_s9, 16, %s863_s5, [#allocation4]  }
 0x1a0   :  { %597 = dma.done.wait [#allocation4], 16  }
 0x1a1   :  { %598 = vsyncadd [#allocation4], 4294967280 }
 0x1a2   :  { %491 = vsyncpa [#allocation4], 1 }

</bundles_post_ra>
